<compile_context>
chip_gen: v7x
topology: tpu7x:2x2x1
jax: 0.10.0
libtpu: 0.0.40
codegen_flags: <defaults>
</compile_context>

<pallas_src>
import functools

import jax
import jax.numpy as jnp
from jax import lax
from jax.experimental import pallas as pl
from jax.experimental.pallas import tpu as pltpu


# --------------------------------------------------------------------------
# helpers
# --------------------------------------------------------------------------
def _pick_tile(n, candidates=(512, 256, 128)):
    """Largest lane-dense tile that divides n (falls back to full extent)."""
    for c in candidates:
        if n % c == 0:
            return c
    return n


def _compiler_params(dimension_semantics):
    """CompilerParams with a scoped-VMEM limit derived from the real chip."""
    kwargs = dict(dimension_semantics=dimension_semantics)
    try:
        cap = int(pltpu.get_tpu_info().vmem_capacity_bytes)
        limit = min((cap * 3) // 4, 64 * 1024 * 1024)  # e.g. 48 MiB on v7x (64 MiB VMEM)
        if limit >= 16 * 1024 * 1024:
            kwargs["vmem_limit_bytes"] = limit
    except Exception:
        pass                                           # keep compiler default
    return pltpu.CompilerParams(**kwargs)


# --------------------------------------------------------------------------
# Pallas kernel 1: adjoint reconstruction  x = y @ A   (A^T y per image),
# tiled over output features (parallel) and the reduction axis (arbitrary)
# with an f32 VMEM accumulator.
# --------------------------------------------------------------------------
def _adjoint_matmul_kernel(y_ref, a_ref, o_ref, acc_ref):
    k = pl.program_id(1)

    @pl.when(k == 0)
    def _():
        acc_ref[...] = jnp.zeros_like(acc_ref)

    acc_ref[...] += jnp.dot(y_ref[...], a_ref[...],
                            preferred_element_type=jnp.float32)

    @pl.when(k == pl.num_programs(1) - 1)
    def _():
        o_ref[...] = acc_ref[...].astype(o_ref.dtype)


def adjoint_apply(y, A):
    """x = y @ A.  y:(B, M)  A:(M, N)  ->  (B, N)."""
    Bm, K = y.shape
    K2, N = A.shape
    assert K == K2
    tn = _pick_tile(N)          # fat, lane-dense output tiles (few grid steps)
    tk = _pick_tile(K)          # bounds VMEM for large measurement counts
    return pl.pallas_call(
        _adjoint_matmul_kernel,
        out_shape=jax.ShapeDtypeStruct((Bm, N), y.dtype),
        grid=(N // tn, K // tk),
        in_specs=[
            pl.BlockSpec((Bm, tk), lambda j, k: (0, k)),
            pl.BlockSpec((tk, tn), lambda j, k: (k, j)),
        ],
        out_specs=pl.BlockSpec((Bm, tn), lambda j, k: (0, j)),
        scratch_shapes=[pltpu.VMEM((Bm, tn), jnp.float32)],
        compiler_params=_compiler_params(("parallel", "arbitrary")),
    )(y, A)


# --------------------------------------------------------------------------
# Pallas kernel 2: fused backbone  conv3x3 -> bias -> ReLU -> conv3x3 -> bias.
# One image per grid step; taps built from shifted VMEM slices of the padded
# input block; h1 (and its zero-padded copy) never leave VMEM.
# --------------------------------------------------------------------------
def _fused_conv_kernel(xp_ref, w1_ref, b1_ref, w2_ref, b2_ref, o_ref, *,
                       H, W, Cin, Fh, Cout):
    # ----- conv1 (3x3 SAME, Cin -> Fh) as a single im2col matmul in VMEM ----
    taps1 = [xp_ref[dy:dy + H, dx:dx + W, :].reshape(H * W, Cin)
             for dy in range(3) for dx in range(3)]
    p1 = jnp.concatenate(taps1, axis=-1)                     # (H*W, 9*Cin)
    h1 = jnp.dot(p1, w1_ref[...], preferred_element_type=jnp.float32)
    h1 = jnp.maximum(h1 + b1_ref[...], 0.0)                  # (H*W, Fh), VMEM only

    # ----- zero-pad h1 spatially (value-level concat, stays in VMEM) --------
    h1_img = h1.reshape(H, W, Fh)
    zr = jnp.zeros((1, W, Fh), jnp.float32)
    zc = jnp.zeros((H + 2, 1, Fh), jnp.float32)
    hp = jnp.concatenate([zr, h1_img, zr], axis=0)           # (H+2, W,   Fh)
    hp = jnp.concatenate([zc, hp, zc], axis=1)               # (H+2, W+2, Fh)

    # ----- conv2 (3x3 SAME, Fh -> Cout) as a single im2col matmul -----------
    taps2 = [hp[dy:dy + H, dx:dx + W, :].reshape(H * W, Fh)
             for dy in range(3) for dx in range(3)]
    p2 = jnp.concatenate(taps2, axis=-1)                     # (H*W, 9*Fh)
    o = jnp.dot(p2, w2_ref[...], preferred_element_type=jnp.float32) + b2_ref[...]
    o_ref[...] = o.astype(o_ref.dtype)


def fused_backbone(x_nhwc, conv1_w, conv1_b, conv2_w, conv2_b):
    """conv3x3+ReLU+conv3x3 (SAME padding), fused in one pallas_call.

    x_nhwc: (B, H, W, Cin); conv*_w are HWIO.  Returns (B*H*W, Cout).
    """
    B, H, W, Cin = x_nhwc.shape
    Fh = conv1_w.shape[-1]
    Cout = conv2_w.shape[-1]
    assert W % 8 == 0, "W must be a multiple of 8 (sublane-aligned reshapes)"

    xp = jnp.pad(x_nhwc, ((0, 0), (1, 1), (1, 1), (0, 0)))   # SAME halo (glue)
    xp = xp.reshape(B * (H + 2), W + 2, Cin)
    w1 = conv1_w.reshape(9 * Cin, Fh)                        # tap-major, c-minor
    w2 = conv2_w.reshape(9 * Fh, Cout)
    b1 = conv1_b.reshape(1, Fh)
    b2 = conv2_b.reshape(1, Cout)

    kern = functools.partial(_fused_conv_kernel,
                             H=H, W=W, Cin=Cin, Fh=Fh, Cout=Cout)
    return pl.pallas_call(
        kern,
        out_shape=jax.ShapeDtypeStruct((B * H * W, Cout), x_nhwc.dtype),
        grid=(B,),
        in_specs=[
            pl.BlockSpec((H + 2, W + 2, Cin), lambda b: (b, 0, 0)),
            pl.BlockSpec((9 * Cin, Fh), lambda b: (0, 0)),
            pl.BlockSpec((1, Fh), lambda b: (0, 0)),
            pl.BlockSpec((9 * Fh, Cout), lambda b: (0, 0)),
            pl.BlockSpec((1, Cout), lambda b: (0, 0)),
        ],
        out_specs=pl.BlockSpec((H * W, Cout), lambda b: (b, 0)),
        compiler_params=_compiler_params(("parallel",)),
    )(xp, w1, b1, w2, b2)


# --------------------------------------------------------------------------
# ArtifactRemoval forward:  phi(A^T y)  with a UNetRes-style noise-map concat.
# --------------------------------------------------------------------------
def artifact_removal_forward(y, A, conv1_w, conv1_b, conv2_w, conv2_b, sigma,
                             *, B, C, H, W, pinv=False):
    # TODO(synk): pinv=True (A^dagger) branch not implemented; only A_adjoint.
    # physics.A_adjoint(y):  y (B, M) @ A (M, N)  ->  (B, N)   [Pallas matmul]
    x = adjoint_apply(y, A)
    x = x.reshape(B, C, H, W)                                   # NCHW

    # UNetRes branch: concatenate a constant noise-level map channel (= sigma).
    # (Kept as an explicit channel -- folding it into conv1's bias would change
    # border pixels because the constant channel is zero-padded by SAME conv.)
    nmap = jnp.full((B, 1, H, W), sigma, x.dtype)
    x = jnp.concatenate([x, nmap], axis=1)                      # (B, C+1, H, W)

    # Backbone (simplified UNetRes stand-in): conv3x3 -> ReLU -> conv3x3,
    # fused into one Pallas kernel with the hidden activation resident in VMEM.
    # TODO(synk): full UNetRes (multi-scale residual U-Net) is not replicated;
    # a 2-layer conv backbone with the same interface is used; the `sigma`
    # argument forwarded by ArtifactRemoval is ignored by this backbone.
    x_nhwc = jnp.transpose(x, (0, 2, 3, 1))                     # NHWC (glue)
    o = fused_backbone(x_nhwc, conv1_w, conv1_b, conv2_w, conv2_b)
    return jnp.transpose(o.reshape(B, H, W, C), (0, 3, 1, 2))   # back to NCHW


# --------------------------------------------------------------------------
# Pure-JAX reference for correctness checking.
# --------------------------------------------------------------------------
def reference_forward(y, A, conv1_w, conv1_b, conv2_w, conv2_b, sigma,
                      *, B, C, H, W):
    x = (y @ A).reshape(B, C, H, W)
    nmap = jnp.full((B, 1, H, W), sigma, x.dtype)
    x = jnp.concatenate([x, nmap], axis=1)
    w1 = jnp.transpose(conv1_w, (3, 2, 0, 1))                   # HWIO -> OIHW
    w2 = jnp.transpose(conv2_w, (3, 2, 0, 1))
    h = lax.conv_general_dilated(x, w1, (1, 1), "SAME",
                                 dimension_numbers=("NCHW", "OIHW", "NCHW"))
    h = jnp.maximum(h + conv1_b[None, :, None, None], 0.0)
    o = lax.conv_general_dilated(h, w2, (1, 1), "SAME",
                                 dimension_numbers=("NCHW", "OIHW", "NCHW"))
    return o + conv2_b[None, :, None, None]


if __name__ == "__main__":
    B, C, H, W = 2, 4, 16, 16       # reconstructed image: (B, C, H, W)
    M = 128                         # number of measurements per image
    Fh = 16                         # backbone hidden channels
    N = C * H * W
    sigma = 0.05                    # physics.noise_model.sigma / kwargs['sigma']

    key = jax.random.PRNGKey(0)
    k1, k2, k3, k4, k5, k6 = jax.random.split(key, 6)
    A = jax.random.normal(k1, (M, N), jnp.float32) / jnp.sqrt(N)      # physics A
    y = jax.random.normal(k2, (B, M), jnp.float32)                    # measurements
    conv1_w = jax.random.normal(k3, (3, 3, C + 1, Fh), jnp.float32) * 0.1  # HWIO
    conv1_b = jax.random.normal(k4, (Fh,), jnp.float32) * 0.1
    conv2_w = jax.random.normal(k5, (3, 3, Fh, C), jnp.float32) * 0.1
    conv2_b = jax.random.normal(k6, (C,), jnp.float32) * 0.1

    out = artifact_removal_forward(y, A, conv1_w, conv1_b, conv2_w, conv2_b,
                                   sigma, B=B, C=C, H=H, W=W)
    out = jax.block_until_ready(out)

    ref = reference_forward(y, A, conv1_w, conv1_b, conv2_w, conv2_b,
                            sigma, B=B, C=C, H=H, W=W)
    assert out.shape == (B, C, H, W)
    assert jnp.allclose(out, ref, atol=1e-4, rtol=1e-4), "mismatch vs reference"
    print("KERNEL_OK")
</pallas_src>

<mosaic_0001>
module attributes {stable_mosaic.version = 11 : i64} {
  func.func @_adjoint_matmul_kernel(%arg0: i32, %arg1: i32, %arg2: memref<2x128xf32, #tpu.memory_space<vmem>>, %arg3: memref<128x512xf32, #tpu.memory_space<vmem>>, %arg4: memref<2x512xf32, #tpu.memory_space<vmem>>, %arg5: memref<2x512xf32, #tpu.memory_space<vmem>>) attributes {dimension_semantics = [#tpu.dimension_semantics<parallel>, #tpu.dimension_semantics<arbitrary>], iteration_bounds = array<i64: 2, 1>, scalar_prefetch = 0 : i64, scratch_operands = 1 : i64, tpu.core_type = #tpu.core_type<tc>, window_params = [{transform_indices = @transform_0, window_bounds = array<i64: 2, 128>}, {transform_indices = @transform_1, window_bounds = array<i64: 128, 512>}, {transform_indices = @transform_2, window_bounds = array<i64: 2, 512>}]} {
    %c0_i32 = arith.constant 0 : i32
    %0 = arith.cmpi eq, %arg1, %c0_i32 : i32
    %1 = arith.extui %0 : i1 to i32
    %c0_i32_0 = arith.constant 0 : i32
    %2 = arith.cmpi ne, %1, %c0_i32_0 : i32
    scf.if %2 {
      %cst_10 = arith.constant 0.000000e+00 : f32
      %12 = vector.broadcast %cst_10 : f32 to vector<2x512xf32>
      %c0_11 = arith.constant 0 : index
      %c0_12 = arith.constant 0 : index
      %13 = vector.load %arg5[%c0_11, %c0_12] : memref<2x512xf32, #tpu.memory_space<vmem>>, vector<2x512xf32>
      tpu.vector_store %arg5[%c0_11, %c0_12], %12 {strides = array<i32>} : memref<2x512xf32, #tpu.memory_space<vmem>>, vector<2x512xf32>,
    } else {
    }
    %c0 = arith.constant 0 : index
    %c0_1 = arith.constant 0 : index
    %3 = vector.load %arg5[%c0, %c0_1] : memref<2x512xf32, #tpu.memory_space<vmem>>, vector<2x512xf32>
    %c0_2 = arith.constant 0 : index
    %c0_3 = arith.constant 0 : index
    %4 = vector.load %arg2[%c0_2, %c0_3] : memref<2x128xf32, #tpu.memory_space<vmem>>, vector<2x128xf32>
    %c0_4 = arith.constant 0 : index
    %c0_5 = arith.constant 0 : index
    %5 = vector.load %arg3[%c0_4, %c0_5] : memref<128x512xf32, #tpu.memory_space<vmem>>, vector<128x512xf32>
    %cst = arith.constant dense<0.000000e+00> : vector<2x512xf32>
    %6 = tpu.matmul %4, %5, %cst {dimension_numbers = #tpu.dot_dimension_numbers<[1], [0], [0], [1], [0, 0, 1, 1], [], []>} : vector<2x128xf32>, vector<128x512xf32>, vector<2x512xf32> -> vector<2x512xf32>
    %7 = arith.addf %3, %6 : vector<2x512xf32>
    %c0_6 = arith.constant 0 : index
    %c0_7 = arith.constant 0 : index
    %8 = vector.load %arg5[%c0_6, %c0_7] : memref<2x512xf32, #tpu.memory_space<vmem>>, vector<2x512xf32>
    tpu.vector_store %arg5[%c0_6, %c0_7], %7 {strides = array<i32>} : memref<2x512xf32, #tpu.memory_space<vmem>>, vector<2x512xf32>,
    %c0_i32_8 = arith.constant 0 : i32
    %9 = arith.cmpi eq, %arg1, %c0_i32_8 : i32
    %10 = arith.extui %9 : i1 to i32
    %c0_i32_9 = arith.constant 0 : i32
    %11 = arith.cmpi ne, %10, %c0_i32_9 : i32
    scf.if %11 {
      %c0_10 = arith.constant 0 : index
      %c0_11 = arith.constant 0 : index
      %12 = vector.load %arg5[%c0_10, %c0_11] : memref<2x512xf32, #tpu.memory_space<vmem>>, vector<2x512xf32>
      %c0_12 = arith.constant 0 : index
      %c0_13 = arith.constant 0 : index
      %13 = vector.load %arg4[%c0_12, %c0_13] : memref<2x512xf32, #tpu.memory_space<vmem>>, vector<2x512xf32>
      tpu.vector_store %arg4[%c0_12, %c0_13], %12 {strides = array<i32>} : memref<2x512xf32, #tpu.memory_space<vmem>>, vector<2x512xf32>,
    } else {
    }
    return
  }
  func.func @transform_0(%arg0: i32, %arg1: i32) -> (i32, i32) {
    %c0_i32 = arith.constant 0 : i32
    %c0_i32_0 = arith.constant 0 : i32
    return %c0_i32, %arg1 : i32, i32
  }
  func.func @transform_1(%arg0: i32, %arg1: i32) -> (i32, i32) {
    %c0_i32 = arith.constant 0 : i32
    return %arg1, %arg0 : i32, i32
  }
  func.func @transform_2(%arg0: i32, %arg1: i32) -> (i32, i32) {
    %c0_i32 = arith.constant 0 : i32
    %c0_i32_0 = arith.constant 0 : i32
    return %c0_i32, %arg0 : i32, i32
  }
}

</mosaic_0001>

<bundles_post_ra>
// kernel: tpu_custom_call.1
= control target key start
LH: loop header
LB: loop body
LE: loop exit
PB: predicated region body
PF: predicated region fallthrough
CT: control target
= control target key end

     0   :  { %7 = vsyncpa [#allocation4], 0  ;;  %s1170_s0 = inlined_call_operand.hbm [shape: f32[2,128], index: 0, kind: input, shape index: {}]   ;;  %s1171_s1 = inlined_call_operand.hbm [shape: f32[128,1024], index: 1, kind: input, shape index: {}]   ;;  %s1172_s2 = inlined_call_operand.hbm [shape: f32[2,1024], index: 2, kind: output, shape index: {}]  }
   0x1   :  { %8 = vsyncpa [#allocation7], 0 }
   0x2   :  { %10 = vsyncpa [#allocation7 + $0x1], 0 }
   0x3   :  { %11 = vsyncpa [#allocation5], 0 }
   0x4   :  { %13 = vsyncpa [#allocation5 + $0x1], 0  ;;  %s884_s9 = smov 0   ;;  %s886_s10 = smov 0  }
   0x5   :  { %s888_s11 = smov 0   ;;  %s890_s12 = smov 0  }
   0x6   :  { %s892_s13 = smov 0   ;;  %s894_s14 = smov 0  }
   0x7 LB: > { %s554_s15 = sadd.s32 4294967295, %s859_s14   ;;  %s555_s16 = sadd.s32 4294967294, %s859_s14   ;;  %s859_s14 = sphi %s894_s14, %s19_s14   ;;  %s855_s13 = sphi %s892_s13, %s1200_s13   ;;  %s851_s12 = sphi %s890_s12, %s1199_s12   ;;  %s847_s11 = sphi %s888_s11, %s1198_s11   ;;  %s843_s10 = sphi %s886_s10, %s1197_s10   ;;  %s839_s9 = sphi %s884_s9, %s1196_s9  }
   0x8   : > { %s66_s17 = sadd.s32 1, %s847_s11  ;;  %p73_p0 = scmp.ne.s32.totalorder %s847_s11, %s843_s10 }
   0x9   : > { %p74_p1 = scmp.eq.s32.totalorder %s859_s14, 0  ;;  %p79_p2 = scmp.ne.s32.totalorder %s843_s10, %s839_s9 }
   0xa   : > { %p922_p3 = scmp.eq.s32.totalorder %s554_s15, 0  ;;  %p103_p4 = scmp.eq.s32.totalorder %s554_s15, 1 }
   0xb   : > { %p926_p5 = por %p74_p1, %p73_p0  ;;  %p109_p6 = scmp.eq.s32.totalorder %s555_s16, 1 }
   0xc   : > { %s1179_s18 = scalar_select %p922_p3, 1, 0 }
   0xd   : > { %p932_p7 = por %p922_p3, %p79_p2  ;;  %p936_p8 = por %p103_p4, %p73_p0 }
   0xe   : > { %p940_p9 = por %p109_p6, %p79_p2  ;;  %p556_p10 = scmp.ge.s32.totalorder %s859_s14, 1 }
   0xf   : > { %s1181_s20 = scalar_select %p932_p7, 1, 0 }
  0x10   : > { %s1182_s21 = scalar_select %p936_p8, 1, 0 }
  0x11   : > { %s1183_s22 = scalar_select %p940_p9, 1, 0 }
  0x12   : > { %p116_p11 = scmp.lt.s32.totalorder %s859_s14, 3  ;;  %s861_s24 = smov [#allocation3]  }
  0x13   : > { %s131_s25 = sshll.u32 %s861_s24, 4  ;;  %p658_p1 = scmp.lt.s32.totalorder %s859_s14, 2  ;;  %s132_s25 = int_to_ptr.vmem [resolvable:$true] %s131_s25 }
  0x14   : > { %p947_p13 = pnand %p556_p10, %p116_p11  ;;  %s31_s28 = sadd.s32 1, %s855_s13 }
  0x15   : > { %p956_p4 = pnand %p658_p1, %p926_p5  ;;  %p967_p6 = scmp.ge.s32.totalorder %s31_s28, 2 }
  0x16   : > { %s1184_s23 = scalar_select %p947_p13, 1, 0 }
  0x17   : > { %p645_p0 = pneg %p947_p13  ;;  %s142_s30 = sand.u32 1, %s847_s11  }
  0x18   : > { %s1185_s26 = scalar_select %p956_p4, 1, 0 }
  0x19   : > { %p962_p2 = pnand %p645_p0, %p922_p3  ;;  %s715_s5 = scalar_lea.hbm %s1170_s0, 32 }
  0x1a   : > { %s1187_s29 = scalar_select %p967_p6, 1, 0 }
  0x1b   : > { %p716_p5 = scmp.ne.s32.totalorder %s1170_s0, %s715_s5  ;;  %p717_p10 = pneg %p962_p2 }
  0x1c   : > { %p722_p0 = scmp.lt.u32.totalorder %s715_s5, %s1170_s0 }
  0x1d   : > { %p718_p11 = pnand %p717_p10, %p716_p5 }
  0x1f   : > { %p719_p1 = pneg %p718_p11 }
  0x21   : > { %p724_p12 = pnand %p722_p0, %p719_p1 }
  0x23   : > { %727 = shalt.err (!%p724_p12)
}
  0x24   : > { %s728_s16 = scalar_lea.vmem %s132_s25, 32  ;;  %p736_p3 = scmp.lt.s32.totalorder %s132_s25, %s132_s25 }
  0x25   : > { %p729_p9 = scmp.ne.s32.totalorder %s132_s25, %s728_s16  ;;  %p737_p13 = scmp.lt.s32.totalorder %s728_s16, %s728_s16 }
  0x27   : > { %p731_p8 = pnand %p729_p9, %p717_p10  ;;  %p738_p4 = por %p737_p13, %p736_p3 }
  0x29   : > { %p732_p7 = pneg %p731_p8 }
  0x2b   : > { %p739_p6 = pnand %p738_p4, %p732_p7 }
  0x2d   : > { %742 = shalt.err (!%p739_p6)
}
  0x2e   : > { %648 = dma.hbm_to_vmem [thread:$0]  (!%p962_p2), %s1170_s0, 32, %s132_s25, [#allocation4]  }
  0x2f   : > { %p1188_p9 = scmp.ne.s32.totalorder %s1187_s29, 0  ;;  %s559_s3 = sshll.u32 %s142_s30, 9 }
  0x30   : > { %s571_s5 = sshll.u32 %s855_s13, 9  ;;  %s146_s8 = scalar_lea.vmem [#allocation6], %s559_s3 }
  0x31   : > { %s1202_s28 = smov (%p1188_p9, %s31_s28), 0  ;;  %s998_s7 = scalar_lea.hbm %s1171_s1, %s571_s5 }
  0x32   : > { %s62_s4 = ssub.s32 %s855_s13, %s1202_s28  ;;  %s156_s15 = sshll.u32 %s146_s8, 4  ;;  %s1005_s15 = int_to_ptr.vmem [resolvable:$true] %s156_s15 }
  0x33   : > { %p64_p3 = scmp.eq.s32.totalorder %s62_s4, 0  ;;  %s1007_s29 = scalar_lea.sflag [#allocation7], %s142_s30 }
  0x34   : > { %s743_s16 = scalar_lea.hbm %s998_s7, 8192  ;;  %p1189_p8 = scmp.ne.s32.totalorder %s1185_s26, 0 }
  0x35   : > { %s1003_s25 = scalar_select %p64_p3, %s847_s11, %s66_s17  }
  0x36   : > { %p744_p7 = scmp.ne.s32.totalorder %s998_s7, %s743_s16  ;;  %p745_p12 = pneg %p1189_p8 }
  0x37   : > { %s748_s3 = scalar_lea.hbm %s1171_s1, 16384  ;;  %p749_p2 = scmp.lt.u32.totalorder %s998_s7, %s1171_s1 }
  0x38   : > { %p746_p13 = pnand %p745_p12, %p744_p7  ;;  %p750_p6 = scmp.lt.u32.totalorder %s748_s3, %s743_s16 }
  0x39   : > { %p752_p10 = scmp.lt.u32.totalorder %s743_s16, %s998_s7 }
  0x3a   : > { %p747_p4 = pneg %p746_p13  ;;  %p751_p5 = por %p750_p6, %p749_p2 }
  0x3c   : > { %p753_p11 = por %p752_p10, %p751_p5 }
  0x3e   : > { %p754_p1 = pnand %p753_p11, %p747_p4 }
  0x40   : > { %757 = shalt.err (!%p754_p1)
}
  0x41   : > { %s758_s17 = scalar_lea.vmem %s1005_s15, 8192  ;;  %s862_s30 = smov [#allocation6]  }
  0x42   : > { %p759_p0 = scmp.ne.s32.totalorder %s1005_s15, %s758_s17  ;;  %s763_s27 = sshll.u32 %s862_s30, 4  ;;  %s764_s27 = int_to_ptr.vmem [resolvable:$false] %s763_s27 }
  0x43   : > { %s765_s6 = scalar_lea.vmem %s764_s27, 16384  ;;  %p766_p7 = scmp.lt.s32.totalorder %s1005_s15, %s764_s27 }
  0x44   : > { %p761_p9 = pnand %p759_p0, %p745_p12  ;;  %p767_p13 = scmp.lt.s32.totalorder %s765_s6, %s758_s17 }
  0x46   : > { %p762_p3 = pneg %p761_p9  ;;  %p768_p2 = por %p767_p13, %p766_p7 }
  0x48   : > { %p769_p6 = pnand %p768_p2, %p762_p3 }
  0x4a   : > { %772 = shalt.err (!%p769_p6)
}
  0x4b   : > { %s863_s8 = smov 1024   ;;  %s864_s16 = smov 512  }
  0x4c   : > { %s865_s19 = smov 32   ;;  %p1190_p12 = scmp.ne.s32.totalorder %s1184_s23, 0 }
  0x4d   : > { %652 = dma.hbm_to_vmem [thread:$0]  (!%p1189_p8), %s998_s7, 8192, %s1005_s15, %s1007_s29, %s863_s8, %s864_s16, %s865_s19  }
  0x4e   : > { %168 = sbr.rel (%p1190_p12) target bundleno = 360 (0x168), region = 28  ;;  %p1191_p4 = scmp.ne.s32.totalorder (!%p1190_p12), %s1179_s18, 0 }
  0x55   : > { %826 = dma.done.wait (%p1191_p4), [#allocation4], 32  }
  0x56   : > { %828 = vsyncadd (%p1191_p4), [#allocation4], 4294967264  ;;  %s1042_s24 = sand.u32 1, %s843_s10   ;;  %p1192_p8 = scmp.ne.s32.totalorder %s1181_s20, 0 }
  0x57   : > { %s564_s3 = sshll.u32 %s1042_s24, 9  ;;  %s175_s4 = scalar_lea.sflag [#allocation7], %s1042_s24 }
  0x58   : > { %s1046_s5 = scalar_lea.vmem [#allocation6], %s564_s3 }
  0x59   : > { %830 = dma.done.wait (%p1192_p8), %s175_s4, 8192  }
  0x5a   : > { %832 = vsyncadd (%p1192_p8), %s175_s4, 4294959104  ;;  %v866_v0 = vmov 0.0   ;;  %v210_v1 = vld [vmem:[%s1046_s5 + $0x8] sm:$0xff]  ;;  %v212_v3 = vld [vmem:[%s1046_s5 + $0x18] sm:$0xff]  ;;  %s565_s18 = sshll.u32 %s1042_s24, 3  ;;  %s572_s20 = sshll.u32 %s851_s12, 7 }
  0x5b   : > { %337 = vmatprep.mubr.f32.mxu0 %v866_v0  ;;  %408 = vmatprep.mubr.f32.mxu1 %v866_v0  ;;  %v214_v2 = vld [vmem:[%s1046_s5 + $0x28] sm:$0xff]  ;;  %v216_v5 = vld [vmem:[%s1046_s5 + $0x38] sm:$0xff]  ;;  %v209_v6 = vld [vmem:[%s1046_s5] sm:$0xff]  ;;  %s198_s23 = scalar_lea.vmem [#allocation8], %s565_s18  ;;  %s1121_s29 = scalar_lea.hbm %s1172_s2, %s572_s20 }
  0x5c   : > { %v573_v4 = vpack.c.bf16 %v214_v2, %v210_v1  ;;  %v213_v7 = vld [vmem:[%s1046_s5 + $0x20] sm:$0xff]  ;;  %v605_v8 = vpack.c.bf16 %v216_v5, %v212_v3  ;;  %v211_v10 = vld [vmem:[%s1046_s5 + $0x10] sm:$0xff]  ;;  %v218_v12 = vld [vmem:[%s1046_s5 + $0x48] sm:$0xff]  ;;  %s459_s26 = sshll.u32 %s198_s23, 4  ;;  %s445_s17 = scalar_lea.sflag [#allocation5], %s1042_s24  ;;  %s1123_s26 = int_to_ptr.vmem [resolvable:$true] %s459_s26 }
  0x5d   : > { %v575_v9 = vpack.c.bf16 %v213_v7, %v209_v6  ;;  %v215_v11 = vld [vmem:[%s1046_s5 + $0x30] sm:$0xff]  ;;  %v222_v14 = vld [vmem:[%s1046_s5 + $0x68] sm:$0xff]  ;;  %v220_v15 = vld [vmem:[%s1046_s5 + $0x58] sm:$0xff]  ;;  %s773_s30 = scalar_lea.vmem %s1123_s26, 128  ;;  %p1193_p10 = scmp.ne.s32.totalorder %s1182_s21, 0 }
  0x5e   : > { %574 = vmatprep.subr.bf16.mxu0 %v573_v4  ;;  %v607_v13 = vpack.c.bf16 %v215_v11, %v211_v10  ;;  %v224_v16 = vld [vmem:[%s1046_s5 + $0x78] sm:$0xff]  ;;  %606 = vmatprep.subr.bf16.mxu1 %v605_v8  ;;  %v577_v17 = vpack.c.bf16 %v222_v14, %v218_v12  ;;  %v217_v19 = vld [vmem:[%s1046_s5 + $0x40] sm:$0xff]  ;;  %v219_v21 = vld [vmem:[%s1046_s5 + $0x50] sm:$0xff]  ;;  %p774_p5 = scmp.ne.s32.totalorder %s1123_s26, %s773_s30  ;;  %s868_s12 = smov [#allocation8]  }
  0x5f   : > { %576 = vmatpush1.bf16.msra.mxu0 %v575_v9  ;;  %v609_v18 = vpack.c.bf16 %v224_v16, %v220_v15  ;;  %v221_v20 = vld [vmem:[%s1046_s5 + $0x60] sm:$0xff]  ;;  %v223_v23 = vld [vmem:[%s1046_s5 + $0x70] sm:$0xff]  ;;  %v226_v24 = vld [vmem:[%s1046_s5 + $0x88] sm:$0xff]  ;;  %s777_s27 = sshll.u32 %s868_s12, 4  ;;  %s778_s27 = int_to_ptr.vmem [resolvable:$false] %s777_s27 }
  0x60   : > { %608 = vmatpush1.bf16.msra.mxu1 %v607_v13  ;;  %v579_v22 = vpack.c.bf16 %v221_v20, %v217_v19  ;;  %v230_v25 = vld [vmem:[%s1046_s5 + $0xa8] sm:$0xff]  ;;  %578 = vmatprep.subr.bf16.mxu0 %v577_v17  ;;  %v611_v26 = vpack.c.bf16 %v223_v23, %v219_v21  ;;  %v228_v28 = vld [vmem:[%s1046_s5 + $0x98] sm:$0xff]  ;;  %v225_v30 = vld [vmem:[%s1046_s5 + $0x80] sm:$0xff]  ;;  %p775_p11 = pnand %p774_p5, %p1193_p10  ;;  %s779_s6 = scalar_lea.vmem %s778_s27, 256 }
  0x61   : > { %610 = vmatprep.subr.bf16.mxu1 %v609_v18  ;;  %v581_v27 = vpack.c.bf16 %v230_v25, %v226_v24  ;;  %v232_v29 = vld [vmem:[%s1046_s5 + $0xb8] sm:$0xff]  ;;  %v229_v32 = vld [vmem:[%s1046_s5 + $0xa0] sm:$0xff]  ;;  %v227_v33 = vld [vmem:[%s1046_s5 + $0x90] sm:$0xff]  ;;  %p780_p0 = scmp.lt.s32.totalorder %s1123_s26, %s778_s27  ;;  %p781_p9 = scmp.lt.s32.totalorder %s779_s6, %s773_s30 }
  0x62   : > { %v613_v31 = vpack.c.bf16 %v232_v29, %v228_v28  ;;  %v231_v34 = vld [vmem:[%s1046_s5 + $0xb0] sm:$0xff]  ;;  %v583_v35 = vpack.c.bf16 %v229_v32, %v225_v30  ;;  %v234_v36 = vld [vmem:[%s1046_s5 + $0xc8] sm:$0xff]  ;;  %v236_v38 = vld [vmem:[%s1046_s5 + $0xd8] sm:$0xff]  ;;  %p776_p1 = pneg %p775_p11 }
  0x63   : > { %580 = vmatpush1.bf16.msra.mxu0 %v579_v22  ;;  %v238_v37 = vld [vmem:[%s1046_s5 + $0xe8] sm:$0xff]  ;;  %v615_v39 = vpack.c.bf16 %v231_v34, %v227_v33  ;;  %v240_v41 = vld [vmem:[%s1046_s5 + $0xf8] sm:$0xff]  ;;  %v233_v42 = vld [vmem:[%s1046_s5 + $0xc0] sm:$0xff]  ;;  %v867_v34 = vmov 1983009808   ;;  %p782_p3 = por %p781_p9, %p780_p0 }
  0x64   : > { %612 = vmatpush1.bf16.msra.mxu1 %v611_v26  ;;  %582 = vmatprep.subr.bf16.mxu0 %v581_v27  ;;  %v585_v40 = vpack.c.bf16 %v238_v37, %v234_v36  ;;  %v237_v43 = vld [vmem:[%s1046_s5 + $0xe0] sm:$0xff]  ;;  %v617_v44 = vpack.c.bf16 %v240_v41, %v236_v38  ;;  %v235_v45 = vld [vmem:[%s1046_s5 + $0xd0] sm:$0xff]  ;;  %v242_v47 = vld [vmem:[%s1046_s5 + $0x108] sm:$0xff]  ;;  %v424_v36 = vlaneseq }
  0x65   : > { %614 = vmatprep.subr.bf16.mxu1 %v613_v31  ;;  %v239_v46 = vld [vmem:[%s1046_s5 + $0xf0] sm:$0xff]  ;;  %v246_v48 = vld [vmem:[%s1046_s5 + $0x128] sm:$0xff]  ;;  %v244_v49 = vld [vmem:[%s1046_s5 + $0x118] sm:$0xff]  ;;  %v587_v51 = vpack.c.bf16 %v237_v43, %v233_v42  ;;  %p783_p7 = pnand %p782_p3, %p776_p1 }
  0x66   : > { %v248_v50 = vld [vmem:[%s1046_s5 + $0x138] sm:$0xff]  ;;  %v619_v52 = vpack.c.bf16 %v239_v46, %v235_v45  ;;  %v589_v53 = vpack.c.bf16 %v246_v48, %v242_v47  ;;  %v241_v54 = vld [vmem:[%s1046_s5 + $0x100] sm:$0xff]  ;;  %v243_v56 = vld [vmem:[%s1046_s5 + $0x110] sm:$0xff]  ;;  %v425_v38 = vshrl.u32 %v424_v36, 7 }
  0x67   : > { %584 = vmatpush1.bf16.msra.mxu0 %v583_v35  ;;  %v245_v55 = vld [vmem:[%s1046_s5 + $0x120] sm:$0xff]  ;;  %v621_v57 = vpack.c.bf16 %v248_v50, %v244_v49  ;;  %v247_v58 = vld [vmem:[%s1046_s5 + $0x130] sm:$0xff]  ;;  %v250_v59 = vld [vmem:[%s1046_s5 + $0x148] sm:$0xff]  ;;  %v422_v35 = vunpack.c.l.s4 %v867_v34 }
  0x68   : > { %616 = vmatpush1.bf16.msra.mxu1 %v615_v39  ;;  %586 = vmatprep.subr.bf16.mxu0 %v585_v40  ;;  %v254_v60 = vld [vmem:[%s1046_s5 + $0x168] sm:$0xff]  ;;  %v252_v61 = vld [vmem:[%s1046_s5 + $0x158] sm:$0xff]  ;;  %v591_v63 = vpack.c.bf16 %v245_v55, %v241_v54  ;;  %v623_v0 = vpack.c.bf16 %v247_v58, %v243_v56  ;;  %v249_v2 = vld [vmem:[%s1046_s5 + $0x140] sm:$0xff] }
  0x69   : > { %618 = vmatprep.subr.bf16.mxu1 %v617_v44  ;;  %v256_v62 = vld [vmem:[%s1046_s5 + $0x178] sm:$0xff]  ;;  %v593_v1 = vpack.c.bf16 %v254_v60, %v250_v59  ;;  %v253_v3 = vld [vmem:[%s1046_s5 + $0x160] sm:$0xff]  ;;  %v251_v4 = vld [vmem:[%s1046_s5 + $0x150] sm:$0xff]  ;;  %v423_v37 = vunpack.c.0.s8 %v422_v35 }
  0x6a   : > { %v625_v5 = vpack.c.bf16 %v256_v62, %v252_v61  ;;  %v255_v6 = vld [vmem:[%s1046_s5 + $0x170] sm:$0xff]  ;;  %v258_v7 = vld [vmem:[%s1046_s5 + $0x188] sm:$0xff]  ;;  %v260_v9 = vld [vmem:[%s1046_s5 + $0x198] sm:$0xff]  ;;  %v595_v11 = vpack.c.bf16 %v253_v3, %v249_v2 }
  0x6b   : > { %588 = vmatpush1.bf16.msra.mxu0 %v587_v51  ;;  %v262_v8 = vld [vmem:[%s1046_s5 + $0x1a8] sm:$0xff]  ;;  %v264_v10 = vld [vmem:[%s1046_s5 + $0x1b8] sm:$0xff]  ;;  %v627_v12 = vpack.c.bf16 %v255_v6, %v251_v4  ;;  %v257_v14 = vld [vmem:[%s1046_s5 + $0x180] sm:$0xff]  ;;  %v426_v40 = vsub.s32 %v423_v37, %v425_v38 }
  0x6c   : > { %620 = vmatpush1.bf16.msra.mxu1 %v619_v52  ;;  %590 = vmatprep.subr.bf16.mxu0 %v589_v53  ;;  %v597_v13 = vpack.c.bf16 %v262_v8, %v258_v7  ;;  %v261_v15 = vld [vmem:[%s1046_s5 + $0x1a0] sm:$0xff]  ;;  %v259_v16 = vld [vmem:[%s1046_s5 + $0x190] sm:$0xff]  ;;  %v629_v17 = vpack.c.bf16 %v264_v10, %v260_v9  ;;  %v266_v19 = vld [vmem:[%s1046_s5 + $0x1c8] sm:$0xff] }
  0x6d   : > { %622 = vmatprep.subr.bf16.mxu1 %v621_v57  ;;  %v263_v18 = vld [vmem:[%s1046_s5 + $0x1b0] sm:$0xff]  ;;  %v270_v20 = vld [vmem:[%s1046_s5 + $0x1e8] sm:$0xff]  ;;  %v268_v21 = vld [vmem:[%s1046_s5 + $0x1d8] sm:$0xff]  ;;  %v599_v23 = vpack.c.bf16 %v261_v15, %v257_v14 }
  0x6e   : > { %v272_v22 = vld [vmem:[%s1046_s5 + $0x1f8] sm:$0xff]  ;;  %v631_v24 = vpack.c.bf16 %v263_v18, %v259_v16  ;;  %v601_v25 = vpack.c.bf16 %v270_v20, %v266_v19  ;;  %v265_v26 = vld [vmem:[%s1046_s5 + $0x1c0] sm:$0xff]  ;;  %v267_v29 = vld [vmem:[%s1046_s5 + $0x1d0] sm:$0xff] }
  0x6f   : > { %592 = vmatpush1.bf16.msra.mxu0 %v591_v63  ;;  %v269_v27 = vld [vmem:[%s1046_s5 + $0x1e0] sm:$0xff]  ;;  %v633_v28 = vpack.c.bf16 %v272_v22, %v268_v21  ;;  %v271_v30 = vld [vmem:[%s1046_s5 + $0x1f0] sm:$0xff]  ;;  %v208_v33 = vld [vmem:[#allocation3] sm:$0x3] }
  0x70   : > { %624 = vmatpush1.bf16.msra.mxu1 %v623_v0  ;;  %594 = vmatprep.subr.bf16.mxu0 %v593_v1  ;;  %v603_v31 = vpack.c.bf16 %v269_v27, %v265_v26  ;;  %v635_v32 = vpack.c.bf16 %v271_v30, %v267_v29 }
  0x71   : > { %626 = vmatprep.subr.bf16.mxu1 %v625_v5 }
  0x73   : > { %596 = vmatpush1.bf16.msra.mxu0 %v595_v11 }
  0x74   : > { %628 = vmatpush1.bf16.msra.mxu1 %v627_v12  ;;  %598 = vmatprep.subr.bf16.mxu0 %v597_v13 }
  0x75   : > { %630 = vmatprep.subr.bf16.mxu1 %v629_v17 }
  0x77   : > { %600 = vmatpush1.bf16.msra.mxu0 %v599_v23 }
  0x78   : > { %632 = vmatpush1.bf16.msra.mxu1 %v631_v24  ;;  %602 = vmatprep.subr.bf16.mxu0 %v601_v25 }
  0x79   : > { %634 = vmatprep.subr.bf16.mxu1 %v633_v28 }
  0x7b   : > { %604 = vmatpush1.bf16.msra.mxu0 %v603_v31 }
  0x7c   : > { %636 = vmatpush1.bf16.msra.mxu1 %v635_v32 }
  0x7e   : > { %338 = vmatmul.mubr.f32.vlgmr.msra.gmra.mrb[0].mxu0 %v208_v33 }
  0x7f   : > { %409 = vmatmul.mubr.f32.vlgmr.msra.gmra.mrb[0].mxu1 %v208_v33 }
 0x151   : > { %v339_v39 = vpop.f32.mrb[0].mxu0 }
 0x152   : > { %v410_v41 = vpop.f32.mrb[0].mxu1  ;;  %v341_v42 = vpop.f32.mrb[1].mxu0 }
 0x153   : > { %v419_v43 = vcombine.low %v339_v39, %v341_v42  ;;  %v412_v44 = vpop.f32.mrb[1].mxu1 }
 0x154   : > { %v420_v45 = vcombine.low %v410_v41, %v412_v44 }
 0x155   : > { %v427_v46 = vrot.slane %v419_v43, %v426_v40 }
 0x156   : > { %v434_v47 = vrot.slane %v420_v45, %v426_v40 }
 0x158   : > { %v435_v48 = vcombine.low %v427_v46, %v434_v47 }
 0x15a   : > { %443 = vst [vmem:[%s198_s23] sm:$0xff] %v435_v48 }
 0x15b   : > { %786 = shalt.err (!%p783_p7)
}
 0x15c   : > { %s787_s8 = scalar_lea.hbm %s1121_s29, 128  ;;  %s791_s24 = scalar_lea.hbm %s1172_s2, 256 }
 0x15d   : > { %p788_p13 = scmp.ne.s32.totalorder %s1121_s29, %s787_s8  ;;  %p792_p12 = scmp.lt.u32.totalorder %s1121_s29, %s1172_s2 }
 0x15e   : > { %p793_p4 = scmp.lt.u32.totalorder %s791_s24, %s787_s8  ;;  %p795_p5 = scmp.lt.u32.totalorder %s787_s8, %s1121_s29 }
 0x15f   : > { %p789_p2 = pnand %p788_p13, %p1193_p10 }
 0x160   : > { %p794_p8 = por %p793_p4, %p792_p12 }
 0x161   : > { %p790_p6 = pneg %p789_p2 }
 0x162   : > { %p796_p11 = por %p795_p5, %p794_p8 }
 0x164   : > { %p797_p1 = pnand %p796_p11, %p790_p6 }
 0x166   : > { %800 = shalt.err (!%p797_p1)
}
 0x167   : > { %643 = dma.vmem_to_hbm [thread:$0]  (%p1193_p10), %s1123_s26, 128, %s1121_s29, %s445_s17  }
 0x168 PF: > { %s471_s5 = sand.u32 1, %s839_s9   ;;  %p1194_p0 = scmp.ne.s32.totalorder %s1183_s22, 0 }
 0x169   : > { %p1195_p9 = scmp.ge.s32.totalorder %s859_s14, 2  ;;  %s472_s18 = scalar_lea.sflag [#allocation5], %s471_s5 }
 0x16b   : > { %p654_p3 = pnand %p1195_p9, %p1194_p0 }
 0x16d   : > { %834 = dma.done.wait (!%p654_p3), %s472_s18, 128  }
 0x16e   : > { %836 = vsyncadd (!%p654_p3), %s472_s18, 4294967168  ;;  %s19_s14 = sadd.s32 1, %s859_s14   ;;  %s1196_s9 = smov %s843_s10 }
 0x16f   : > { %p16_p7 = scmp.ge.s32.totalorder %s19_s14, 4   ;;  %s1197_s10 = smov %s847_s11 }
 0x170   : > { %s1198_s11 = smov %s1003_s25  ;;  %s1199_s12 = smov %s855_s13 }
 0x171   : > { %s1200_s13 = smov %s1202_s28  ;;  %18 = sbr.rel (!%p16_p7) target bundleno = 7 (0x7), region = 87 }
 0x178   :  { %477 = vsyncpa [#allocation4], 1 }
 0x179   :  { %479 = vsyncpa [#allocation4 + $0x1], 1 }
 0x17a   :  { %480 = vsyncpa [#allocation7], 1 }
 0x17b   :  { %482 = vsyncpa [#allocation7 + $0x1], 1 }
 0x17c   :  { %483 = vsyncpa [#allocation5], 1 }
 0x17d   :  { %485 = vsyncpa [#allocation5 + $0x1], 1 }

</bundles_post_ra>
